<compile_context>
chip_gen: v7x
topology: tpu7x:2x2x1
jax: 0.10.0
libtpu: 0.0.40
codegen_flags: <defaults>
</compile_context>

<pallas_src>
import functools

import jax
import jax.numpy as jnp
from jax import lax
from jax.experimental import pallas as pl
from jax.experimental.pallas import tpu as pltpu


def _round8(n):
    return ((n + 7) // 8) * 8


def _lan_tree_kernel(feats_ref, adjs_ref, wg_ref, bg_ref, wih_ref, whh_ref,
                     brnn_ref, out_ref, h_scr,
                     *, level_sizes, feat_off, adj_off, C, H, D):
    """Whole-tree bottom-up propagation in a single kernel invocation.

    h_scr (VMEM) holds the hiddens of the most recently processed level; parents
    read it, then overwrite its leading rows with their own hiddens.
    """
    L = len(level_sizes)
    for lv in range(L - 1, -1, -1):          # deepest level first (children before parents)
        n = level_sizes[lv]

        # ---- RNN input projection: x @ W_ih + b --------------------------------
        x = feats_ref[pl.ds(feat_off[lv], n), :]                        # (n, D)
        wih = wih_ref[pl.ds(lv * D, D), :]                              # (D, H)
        brnn = brnn_ref[pl.ds(lv, 1), :]                                # (1, H)
        pre = jnp.dot(x, wih, preferred_element_type=jnp.float32) + brnn

        if lv < L - 1:
            # ---- GNN + max-pool readout (non-leaf levels only) -----------------
            nc = level_sizes[lv + 1]                                    # == n * C children
            ch = h_scr[pl.ds(0, nc), :]                                 # (n*C, H)
            wg = wg_ref[pl.ds(lv * H, H), :]                            # (H, H)
            bg = bg_ref[pl.ds(lv, 1), :]                                # (1, H)
            # (A_c @ CH) @ W_g == A_c @ (CH @ W_g): one fat MXU matmul for the
            # whole level, then the CxC contraction as VPU broadcast-MACs.
            p = jnp.dot(ch, wg, preferred_element_type=jnp.float32)     # (n*C, H)
            # Hoist the C child-slot views (slot-major rows) once per level.
            p_slot = [p[d * n:(d + 1) * n, :] for d in range(C)]        # each (n, H)
            A = adjs_ref[pl.ds(adj_off[lv], n), :]                      # (n, C*C), col = c*C + d

            aggs = []
            for c in range(C):
                agg_c = A[:, c * C:c * C + 1] * p_slot[0]               # child-slot 0
                for d in range(1, C):
                    agg_c = agg_c + A[:, c * C + d:c * C + d + 1] * p_slot[d]
                aggs.append(agg_c)
            # Pairwise-tree max readout; ReLU + b_g pulled outside the max
            # (exactly equal: max_c relu(a_c + b) == relu(max_c a_c + b)).
            while len(aggs) > 1:
                nxt = [jnp.maximum(aggs[i], aggs[i + 1])
                       for i in range(0, len(aggs) - 1, 2)]
                if len(aggs) % 2:
                    nxt.append(aggs[-1])
                aggs = nxt
            pooled = jnp.maximum(aggs[0] + bg, 0.0)                     # (n, H)

            whh = whh_ref[pl.ds(lv * H, H), :]                          # (H, H)
            pre = pre + jnp.dot(pooled, whh, preferred_element_type=jnp.float32)
        # leaf level: zero_hiddens  =>  the W_hh term is exactly zero; skipped.

        h = jnp.tanh(pre)                                               # (n, H)
        if lv > 0:
            h_scr[pl.ds(0, n), :] = h        # becomes child hiddens of level lv-1
        else:
            out_ref[...] = h.astype(out_ref.dtype)                      # root hiddens


def lan_forward_pallas(feats, adjs, params, *, C, H):
    """Fused forward over all tree levels in a single pallas_call.

    feats : list of (n_lv, D) per level (lv = 0 .. L-1, n_lv = n_roots * C**lv)
    adjs  : list of (n_lv, C, C) child-adjacency per non-leaf level (lv = 0 .. L-2)
    params: list of (W_g (H,H), b_g (1,H), W_ih (D,H), W_hh (H,H), b (1,H)) per level
    """
    L = len(feats)
    D = feats[0].shape[1]
    level_sizes = tuple(int(f.shape[0]) for f in feats)
    num_roots = level_sizes[0]
    for lv in range(L - 1):
        assert level_sizes[lv + 1] == level_sizes[lv] * C

    # --- pack node features, each level padded to a multiple of 8 rows ----------
    feat_off, blocks, off = [], [], 0
    for lv in range(L):
        n = level_sizes[lv]
        npad = _round8(n)
        feat_off.append(off)
        blocks.append(jnp.pad(feats[lv].astype(jnp.float32), ((0, npad - n), (0, 0))))
        off += npad
    feats_all = jnp.concatenate(blocks, axis=0)

    # --- pack child adjacency for non-leaf levels, flattened to (n, C*C) --------
    adj_off, blocks, off = [], [], 0
    for lv in range(L - 1):
        n = level_sizes[lv]
        npad = _round8(n)
        adj_off.append(off)
        blocks.append(jnp.pad(adjs[lv].reshape(n, C * C).astype(jnp.float32),
                              ((0, npad - n), (0, 0))))
        off += npad
    if blocks:
        adjs_all = jnp.concatenate(blocks, axis=0)
    else:                                    # L == 1: no GNN levels, dummy buffer
        adjs_all = jnp.zeros((8, C * C), jnp.float32)
        adj_off = [0]

    # --- stack per-level weights along rows (all 2-D, statically sliced) --------
    wg_all = jnp.concatenate([p[0] for p in params], axis=0)              # (L*H, H)
    bg_all = jnp.concatenate([p[1].reshape(1, H) for p in params], 0)     # (L, H)
    wih_all = jnp.concatenate([p[2] for p in params], axis=0)             # (L*D, H)
    whh_all = jnp.concatenate([p[3] for p in params], axis=0)             # (L*H, H)
    brnn_all = jnp.concatenate([p[4].reshape(1, H) for p in params], 0)   # (L, H)

    scr_rows = max(8, _round8(level_sizes[-1]))      # largest (deepest) level

    kernel = functools.partial(
        _lan_tree_kernel,
        level_sizes=level_sizes, feat_off=tuple(feat_off), adj_off=tuple(adj_off),
        C=C, H=H, D=D)

    ins = (feats_all, adjs_all, wg_all, bg_all, wih_all, whh_all, brnn_all)

    def _full(arr):
        nd = arr.ndim
        return pl.BlockSpec(arr.shape, lambda i, _nd=nd: (0,) * _nd)

    return pl.pallas_call(
        kernel,
        out_shape=jax.ShapeDtypeStruct((num_roots, H), jnp.float32),
        grid=(1,),
        in_specs=[_full(a) for a in ins],
        out_specs=pl.BlockSpec((num_roots, H), lambda i: (0, 0)),
        scratch_shapes=[pltpu.VMEM((scr_rows, H), jnp.float32)],
        compiler_params=pltpu.CompilerParams(
            dimension_semantics=("arbitrary",)),
    )(*ins)


def lan_forward_reference(feats, adjs, params, *, C, H):
    """Pure-JAX reference with identical math and tree layout (slot-major children)."""
    L = len(feats)
    h_child = None
    for lv in range(L - 1, -1, -1):
        x = feats[lv]
        n = x.shape[0]
        wg, bg, wih, whh, brnn = params[lv]
        if lv == L - 1:
            pooled = jnp.zeros((n, H), jnp.float32)
        else:
            # child-level node j is child-slot j // n of parent j % n
            ch = h_child.reshape(C, n, H).transpose(1, 0, 2)              # (n, C, H)
            agg = jnp.einsum('ncd,ndh->nch', adjs[lv], ch,
                             precision=lax.Precision.HIGHEST)
            g = jnp.maximum(jnp.einsum('nch,hk->nck', agg, wg,
                                       precision=lax.Precision.HIGHEST) + bg, 0.0)
            pooled = jnp.max(g, axis=1)                                   # (n, H)
        h = jnp.tanh(jnp.dot(x, wih, precision=lax.Precision.HIGHEST)
                     + jnp.dot(pooled, whh, precision=lax.Precision.HIGHEST)
                     + brnn)
        h_child = h
    return h_child


if __name__ == "__main__":
    # Module hyper-parameters (small, consistent with __init__):
    input_dim = 6
    type_count = 2                      # len(feature_extraction_networks.type_keys)
    D = input_dim + type_count          # input_dim_with_bias = 8
    H = 32                              # hidden_dim
    max_lv = 3
    C = 4                               # children per non-leaf node (complete C-ary tree)
    num_roots = 2

    key = jax.random.PRNGKey(0)

    # Per-level parameters: gnn[i] (W_g, b_g) and rnn[i] (W_ih, W_hh, b).
    params = []
    for _ in range(max_lv):
        key, k1, k2, k3, k4, k5 = jax.random.split(key, 6)
        params.append((
            jax.random.normal(k1, (H, H), jnp.float32) * 0.1,   # W_g
            jax.random.normal(k2, (1, H), jnp.float32) * 0.01,  # b_g
            jax.random.normal(k3, (D, H), jnp.float32) * 0.1,   # W_ih
            jax.random.normal(k4, (H, H), jnp.float32) * 0.1,   # W_hh
            jax.random.normal(k5, (1, H), jnp.float32) * 0.01,  # b_rnn
        ))

    # Complete C-ary tree: level lv has num_roots * C**lv nodes.
    feats, adjs = [], []
    for lv in range(max_lv):
        n = num_roots * (C ** lv)
        key, kf = jax.random.split(key)
        feats.append(jax.random.normal(kf, (n, D), jnp.float32))
        if lv < max_lv - 1:
            key, ka = jax.random.split(key)
            adjs.append((jax.random.uniform(ka, (n, C, C)) > 0.5).astype(jnp.float32))

    root_hiddens = lan_forward_pallas(feats, adjs, params, C=C, H=H)
    root_hiddens = jax.block_until_ready(root_hiddens)

    ref = lan_forward_reference(feats, adjs, params, C=C, H=H)

    assert root_hiddens.shape == (num_roots, H)
    assert bool(jnp.all(jnp.isfinite(root_hiddens)))
    max_err = float(jnp.max(jnp.abs(root_hiddens - ref)))
    assert jnp.allclose(root_hiddens, ref, rtol=2e-3, atol=2e-3), max_err
    print("KERNEL_OK")
</pallas_src>

<mosaic_0001>
module attributes {stable_mosaic.version = 11 : i64} {
  func.func @_lan_tree_kernel(%arg0: i32, %arg1: memref<48x8xf32, #tpu.memory_space<vmem>>, %arg2: memref<16x16xf32, #tpu.memory_space<vmem>>, %arg3: memref<96x32xf32, #tpu.memory_space<vmem>>, %arg4: memref<3x32xf32, #tpu.memory_space<vmem>>, %arg5: memref<24x32xf32, #tpu.memory_space<vmem>>, %arg6: memref<96x32xf32, #tpu.memory_space<vmem>>, %arg7: memref<3x32xf32, #tpu.memory_space<vmem>>, %arg8: memref<2x32xf32, #tpu.memory_space<vmem>>, %arg9: memref<32x32xf32, #tpu.memory_space<vmem>>) attributes {dimension_semantics = [#tpu.dimension_semantics<arbitrary>], iteration_bounds = array<i64: 1>, scalar_prefetch = 0 : i64, scratch_operands = 1 : i64, tpu.core_type = #tpu.core_type<tc>, window_params = [{pipeline_mode = #tpu.pipeline_mode<synchronous>, transform_indices = @transform_0, window_bounds = array<i64: 48, 8>}, {pipeline_mode = #tpu.pipeline_mode<synchronous>, transform_indices = @transform_1, window_bounds = array<i64: 16, 16>}, {pipeline_mode = #tpu.pipeline_mode<synchronous>, transform_indices = @transform_2, window_bounds = array<i64: 96, 32>}, {pipeline_mode = #tpu.pipeline_mode<synchronous>, transform_indices = @transform_3, window_bounds = array<i64: 3, 32>}, {pipeline_mode = #tpu.pipeline_mode<synchronous>, transform_indices = @transform_4, window_bounds = array<i64: 24, 32>}, {pipeline_mode = #tpu.pipeline_mode<synchronous>, transform_indices = @transform_5, window_bounds = array<i64: 96, 32>}, {pipeline_mode = #tpu.pipeline_mode<synchronous>, transform_indices = @transform_6, window_bounds = array<i64: 3, 32>}, {pipeline_mode = #tpu.pipeline_mode<synchronous>, transform_indices = @transform_7, window_bounds = array<i64: 2, 32>}]} {
    %c16 = arith.constant 16 : index
    %c0 = arith.constant 0 : index
    %0 = vector.load %arg1[%c16, %c0] : memref<48x8xf32, #tpu.memory_space<vmem>>, vector<32x8xf32>
    %c16_0 = arith.constant 16 : index
    %c0_1 = arith.constant 0 : index
    %1 = vector.load %arg5[%c16_0, %c0_1] : memref<24x32xf32, #tpu.memory_space<vmem>>, vector<8x32xf32>
    %c2 = arith.constant 2 : index
    %c0_2 = arith.constant 0 : index
    %2 = vector.load %arg7[%c2, %c0_2] : memref<3x32xf32, #tpu.memory_space<vmem>>, vector<1x32xf32>
    %cst = arith.constant dense<0.000000e+00> : vector<32x32xf32>
    %3 = tpu.matmul %0, %1, %cst {dimension_numbers = #tpu.dot_dimension_numbers<[1], [0], [0], [1], [0, 0, 1, 1], [], []>} : vector<32x8xf32>, vector<8x32xf32>, vector<32x32xf32> -> vector<32x32xf32>
    %4 = vector.broadcast %2 : vector<1x32xf32> to vector<32x32xf32>
    %5 = arith.addf %3, %4 : vector<32x32xf32>
    %6 = math.tanh %5 : vector<32x32xf32>
    %c0_3 = arith.constant 0 : index
    %c0_4 = arith.constant 0 : index
    %7 = vector.load %arg9[%c0_3, %c0_4] : memref<32x32xf32, #tpu.memory_space<vmem>>, vector<32x32xf32>
    tpu.vector_store %arg9[%c0_3, %c0_4], %6 {strides = array<i32>} : memref<32x32xf32, #tpu.memory_space<vmem>>, vector<32x32xf32>,
    %c8 = arith.constant 8 : index
    %c0_5 = arith.constant 0 : index
    %8 = vector.load %arg1[%c8, %c0_5] : memref<48x8xf32, #tpu.memory_space<vmem>>, vector<8x8xf32>
    %c8_6 = arith.constant 8 : index
    %c0_7 = arith.constant 0 : index
    %9 = vector.load %arg5[%c8_6, %c0_7] : memref<24x32xf32, #tpu.memory_space<vmem>>, vector<8x32xf32>
    %c1 = arith.constant 1 : index
    %c0_8 = arith.constant 0 : index
    %10 = vector.load %arg7[%c1, %c0_8] : memref<3x32xf32, #tpu.memory_space<vmem>>, vector<1x32xf32>
    %cst_9 = arith.constant dense<0.000000e+00> : vector<8x32xf32>
    %11 = tpu.matmul %8, %9, %cst_9 {dimension_numbers = #tpu.dot_dimension_numbers<[1], [0], [0], [1], [0, 0, 1, 1], [], []>} : vector<8x8xf32>, vector<8x32xf32>, vector<8x32xf32> -> vector<8x32xf32>
    %12 = vector.broadcast %10 : vector<1x32xf32> to vector<8x32xf32>
    %13 = arith.addf %11, %12 : vector<8x32xf32>
    %c0_10 = arith.constant 0 : index
    %c0_11 = arith.constant 0 : index
    %14 = vector.load %arg9[%c0_10, %c0_11] : memref<32x32xf32, #tpu.memory_space<vmem>>, vector<32x32xf32>
    %c32 = arith.constant 32 : index
    %c0_12 = arith.constant 0 : index
    %15 = vector.load %arg3[%c32, %c0_12] : memref<96x32xf32, #tpu.memory_space<vmem>>, vector<32x32xf32>
    %c1_13 = arith.constant 1 : index
    %c0_14 = arith.constant 0 : index
    %16 = vector.load %arg4[%c1_13, %c0_14] : memref<3x32xf32, #tpu.memory_space<vmem>>, vector<1x32xf32>
    %cst_15 = arith.constant dense<0.000000e+00> : vector<32x32xf32>
    %17 = tpu.matmul %14, %15, %cst_15 {dimension_numbers = #tpu.dot_dimension_numbers<[1], [0], [0], [1], [0, 0, 1, 1], [], []>} : vector<32x32xf32>, vector<32x32xf32>, vector<32x32xf32> -> vector<32x32xf32>
    %18 = vector.extract_strided_slice %17 {offsets = [0, 0], sizes = [8, 32], strides = [1, 1]} : vector<32x32xf32> to vector<8x32xf32>
    %19 = vector.extract_strided_slice %17 {offsets = [8, 0], sizes = [8, 32], strides = [1, 1]} : vector<32x32xf32> to vector<8x32xf32>
    %20 = vector.extract_strided_slice %17 {offsets = [16, 0], sizes = [8, 32], strides = [1, 1]} : vector<32x32xf32> to vector<8x32xf32>
    %21 = vector.extract_strided_slice %17 {offsets = [24, 0], sizes = [8, 32], strides = [1, 1]} : vector<32x32xf32> to vector<8x32xf32>
    %c8_16 = arith.constant 8 : index
    %c0_17 = arith.constant 0 : index
    %22 = vector.load %arg2[%c8_16, %c0_17] : memref<16x16xf32, #tpu.memory_space<vmem>>, vector<8x16xf32>
    %23 = vector.extract_strided_slice %22 {offsets = [0, 0], sizes = [8, 1], strides = [1, 1]} : vector<8x16xf32> to vector<8x1xf32>
    %24 = vector.broadcast %23 : vector<8x1xf32> to vector<8x32xf32>
    %25 = arith.mulf %24, %18 : vector<8x32xf32>
    %26 = vector.extract_strided_slice %22 {offsets = [0, 1], sizes = [8, 1], strides = [1, 1]} : vector<8x16xf32> to vector<8x1xf32>
    %27 = vector.broadcast %26 : vector<8x1xf32> to vector<8x32xf32>
    %28 = arith.mulf %27, %19 : vector<8x32xf32>
    %29 = arith.addf %25, %28 : vector<8x32xf32>
    %30 = vector.extract_strided_slice %22 {offsets = [0, 2], sizes = [8, 1], strides = [1, 1]} : vector<8x16xf32> to vector<8x1xf32>
    %31 = vector.broadcast %30 : vector<8x1xf32> to vector<8x32xf32>
    %32 = arith.mulf %31, %20 : vector<8x32xf32>
    %33 = arith.addf %29, %32 : vector<8x32xf32>
    %34 = vector.extract_strided_slice %22 {offsets = [0, 3], sizes = [8, 1], strides = [1, 1]} : vector<8x16xf32> to vector<8x1xf32>
    %35 = vector.broadcast %34 : vector<8x1xf32> to vector<8x32xf32>
    %36 = arith.mulf %35, %21 : vector<8x32xf32>
    %37 = arith.addf %33, %36 : vector<8x32xf32>
    %38 = vector.extract_strided_slice %22 {offsets = [0, 4], sizes = [8, 1], strides = [1, 1]} : vector<8x16xf32> to vector<8x1xf32>
    %39 = vector.broadcast %38 : vector<8x1xf32> to vector<8x32xf32>
    %40 = arith.mulf %39, %18 : vector<8x32xf32>
    %41 = vector.extract_strided_slice %22 {offsets = [0, 5], sizes = [8, 1], strides = [1, 1]} : vector<8x16xf32> to vector<8x1xf32>
    %42 = vector.broadcast %41 : vector<8x1xf32> to vector<8x32xf32>
    %43 = arith.mulf %42, %19 : vector<8x32xf32>
    %44 = arith.addf %40, %43 : vector<8x32xf32>
    %45 = vector.extract_strided_slice %22 {offsets = [0, 6], sizes = [8, 1], strides = [1, 1]} : vector<8x16xf32> to vector<8x1xf32>
    %46 = vector.broadcast %45 : vector<8x1xf32> to vector<8x32xf32>
    %47 = arith.mulf %46, %20 : vector<8x32xf32>
    %48 = arith.addf %44, %47 : vector<8x32xf32>
    %49 = vector.extract_strided_slice %22 {offsets = [0, 7], sizes = [8, 1], strides = [1, 1]} : vector<8x16xf32> to vector<8x1xf32>
    %50 = vector.broadcast %49 : vector<8x1xf32> to vector<8x32xf32>
    %51 = arith.mulf %50, %21 : vector<8x32xf32>
    %52 = arith.addf %48, %51 : vector<8x32xf32>
    %53 = vector.extract_strided_slice %22 {offsets = [0, 8], sizes = [8, 1], strides = [1, 1]} : vector<8x16xf32> to vector<8x1xf32>
    %54 = vector.broadcast %53 : vector<8x1xf32> to vector<8x32xf32>
    %55 = arith.mulf %54, %18 : vector<8x32xf32>
    %56 = vector.extract_strided_slice %22 {offsets = [0, 9], sizes = [8, 1], strides = [1, 1]} : vector<8x16xf32> to vector<8x1xf32>
    %57 = vector.broadcast %56 : vector<8x1xf32> to vector<8x32xf32>
    %58 = arith.mulf %57, %19 : vector<8x32xf32>
    %59 = arith.addf %55, %58 : vector<8x32xf32>
    %60 = vector.extract_strided_slice %22 {offsets = [0, 10], sizes = [8, 1], strides = [1, 1]} : vector<8x16xf32> to vector<8x1xf32>
    %61 = vector.broadcast %60 : vector<8x1xf32> to vector<8x32xf32>
    %62 = arith.mulf %61, %20 : vector<8x32xf32>
    %63 = arith.addf %59, %62 : vector<8x32xf32>
    %64 = vector.extract_strided_slice %22 {offsets = [0, 11], sizes = [8, 1], strides = [1, 1]} : vector<8x16xf32> to vector<8x1xf32>
    %65 = vector.broadcast %64 : vector<8x1xf32> to vector<8x32xf32>
    %66 = arith.mulf %65, %21 : vector<8x32xf32>
    %67 = arith.addf %63, %66 : vector<8x32xf32>
    %68 = vector.extract_strided_slice %22 {offsets = [0, 12], sizes = [8, 1], strides = [1, 1]} : vector<8x16xf32> to vector<8x1xf32>
    %69 = vector.broadcast %68 : vector<8x1xf32> to vector<8x32xf32>
    %70 = arith.mulf %69, %18 : vector<8x32xf32>
    %71 = vector.extract_strided_slice %22 {offsets = [0, 13], sizes = [8, 1], strides = [1, 1]} : vector<8x16xf32> to vector<8x1xf32>
    %72 = vector.broadcast %71 : vector<8x1xf32> to vector<8x32xf32>
    %73 = arith.mulf %72, %19 : vector<8x32xf32>
    %74 = arith.addf %70, %73 : vector<8x32xf32>
    %75 = vector.extract_strided_slice %22 {offsets = [0, 14], sizes = [8, 1], strides = [1, 1]} : vector<8x16xf32> to vector<8x1xf32>
    %76 = vector.broadcast %75 : vector<8x1xf32> to vector<8x32xf32>
    %77 = arith.mulf %76, %20 : vector<8x32xf32>
    %78 = arith.addf %74, %77 : vector<8x32xf32>
    %79 = vector.extract_strided_slice %22 {offsets = [0, 15], sizes = [8, 1], strides = [1, 1]} : vector<8x16xf32> to vector<8x1xf32>
    %80 = vector.broadcast %79 : vector<8x1xf32> to vector<8x32xf32>
    %81 = arith.mulf %80, %21 : vector<8x32xf32>
    %82 = arith.addf %78, %81 : vector<8x32xf32>
    %83 = arith.maximumf %37, %52 : vector<8x32xf32>
    %84 = arith.maximumf %67, %82 : vector<8x32xf32>
    %85 = arith.maximumf %83, %84 : vector<8x32xf32>
    %86 = vector.broadcast %16 : vector<1x32xf32> to vector<8x32xf32>
    %87 = arith.addf %85, %86 : vector<8x32xf32>
    %cst_18 = arith.constant 0.000000e+00 : f32
    %88 = vector.broadcast %cst_18 : f32 to vector<8x32xf32>
    %89 = arith.maximumf %87, %88 : vector<8x32xf32>
    %c32_19 = arith.constant 32 : index
    %c0_20 = arith.constant 0 : index
    %90 = vector.load %arg6[%c32_19, %c0_20] : memref<96x32xf32, #tpu.memory_space<vmem>>, vector<32x32xf32>
    %cst_21 = arith.constant dense<0.000000e+00> : vector<8x32xf32>
    %91 = tpu.matmul %89, %90, %cst_21 {dimension_numbers = #tpu.dot_dimension_numbers<[1], [0], [0], [1], [0, 0, 1, 1], [], []>} : vector<8x32xf32>, vector<32x32xf32>, vector<8x32xf32> -> vector<8x32xf32>
    %92 = arith.addf %13, %91 : vector<8x32xf32>
    %93 = math.tanh %92 : vector<8x32xf32>
    %c0_22 = arith.constant 0 : index
    %c0_23 = arith.constant 0 : index
    %94 = vector.load %arg9[%c0_22, %c0_23] : memref<32x32xf32, #tpu.memory_space<vmem>>, vector<8x32xf32>
    tpu.vector_store %arg9[%c0_22, %c0_23], %93 {strides = array<i32>} : memref<32x32xf32, #tpu.memory_space<vmem>>, vector<8x32xf32>,
    %c0_24 = arith.constant 0 : index
    %c0_25 = arith.constant 0 : index
    %95 = vector.load %arg1[%c0_24, %c0_25] : memref<48x8xf32, #tpu.memory_space<vmem>>, vector<2x8xf32>
    %c0_26 = arith.constant 0 : index
    %c0_27 = arith.constant 0 : index
    %96 = vector.load %arg5[%c0_26, %c0_27] : memref<24x32xf32, #tpu.memory_space<vmem>>, vector<8x32xf32>
    %c0_28 = arith.constant 0 : index
    %c0_29 = arith.constant 0 : index
    %97 = vector.load %arg7[%c0_28, %c0_29] : memref<3x32xf32, #tpu.memory_space<vmem>>, vector<1x32xf32>
    %cst_30 = arith.constant dense<0.000000e+00> : vector<2x32xf32>
    %98 = tpu.matmul %95, %96, %cst_30 {dimension_numbers = #tpu.dot_dimension_numbers<[1], [0], [0], [1], [0, 0, 1, 1], [], []>} : vector<2x8xf32>, vector<8x32xf32>, vector<2x32xf32> -> vector<2x32xf32>
    %99 = vector.broadcast %97 : vector<1x32xf32> to vector<2x32xf32>
    %100 = arith.addf %98, %99 : vector<2x32xf32>
    %c0_31 = arith.constant 0 : index
    %c0_32 = arith.constant 0 : index
    %101 = vector.load %arg9[%c0_31, %c0_32] : memref<32x32xf32, #tpu.memory_space<vmem>>, vector<8x32xf32>
    %c0_33 = arith.constant 0 : index
    %c0_34 = arith.constant 0 : index
    %102 = vector.load %arg3[%c0_33, %c0_34] : memref<96x32xf32, #tpu.memory_space<vmem>>, vector<32x32xf32>
    %c0_35 = arith.constant 0 : index
    %c0_36 = arith.constant 0 : index
    %103 = vector.load %arg4[%c0_35, %c0_36] : memref<3x32xf32, #tpu.memory_space<vmem>>, vector<1x32xf32>
    %cst_37 = arith.constant dense<0.000000e+00> : vector<8x32xf32>
    %104 = tpu.matmul %101, %102, %cst_37 {dimension_numbers = #tpu.dot_dimension_numbers<[1], [0], [0], [1], [0, 0, 1, 1], [], []>} : vector<8x32xf32>, vector<32x32xf32>, vector<8x32xf32> -> vector<8x32xf32>
    %105 = vector.extract_strided_slice %104 {offsets = [0, 0], sizes = [2, 32], strides = [1, 1]} : vector<8x32xf32> to vector<2x32xf32>
    %106 = vector.extract_strided_slice %104 {offsets = [2, 0], sizes = [2, 32], strides = [1, 1]} : vector<8x32xf32> to vector<2x32xf32>
    %107 = vector.extract_strided_slice %104 {offsets = [4, 0], sizes = [2, 32], strides = [1, 1]} : vector<8x32xf32> to vector<2x32xf32>
    %108 = vector.extract_strided_slice %104 {offsets = [6, 0], sizes = [2, 32], strides = [1, 1]} : vector<8x32xf32> to vector<2x32xf32>
    %c0_38 = arith.constant 0 : index
    %c0_39 = arith.constant 0 : index
    %109 = vector.load %arg2[%c0_38, %c0_39] : memref<16x16xf32, #tpu.memory_space<vmem>>, vector<2x16xf32>
    %110 = vector.extract_strided_slice %109 {offsets = [0, 0], sizes = [2, 1], strides = [1, 1]} : vector<2x16xf32> to vector<2x1xf32>
    %111 = vector.broadcast %110 : vector<2x1xf32> to vector<2x32xf32>
    %112 = arith.mulf %111, %105 : vector<2x32xf32>
    %113 = vector.extract_strided_slice %109 {offsets = [0, 1], sizes = [2, 1], strides = [1, 1]} : vector<2x16xf32> to vector<2x1xf32>
    %114 = vector.broadcast %113 : vector<2x1xf32> to vector<2x32xf32>
    %115 = arith.mulf %114, %106 : vector<2x32xf32>
    %116 = arith.addf %112, %115 : vector<2x32xf32>
    %117 = vector.extract_strided_slice %109 {offsets = [0, 2], sizes = [2, 1], strides = [1, 1]} : vector<2x16xf32> to vector<2x1xf32>
    %118 = vector.broadcast %117 : vector<2x1xf32> to vector<2x32xf32>
    %119 = arith.mulf %118, %107 : vector<2x32xf32>
    %120 = arith.addf %116, %119 : vector<2x32xf32>
    %121 = vector.extract_strided_slice %109 {offsets = [0, 3], sizes = [2, 1], strides = [1, 1]} : vector<2x16xf32> to vector<2x1xf32>
    %122 = vector.broadcast %121 : vector<2x1xf32> to vector<2x32xf32>
    %123 = arith.mulf %122, %108 : vector<2x32xf32>
    %124 = arith.addf %120, %123 : vector<2x32xf32>
    %125 = vector.extract_strided_slice %109 {offsets = [0, 4], sizes = [2, 1], strides = [1, 1]} : vector<2x16xf32> to vector<2x1xf32>
    %126 = vector.broadcast %125 : vector<2x1xf32> to vector<2x32xf32>
    %127 = arith.mulf %126, %105 : vector<2x32xf32>
    %128 = vector.extract_strided_slice %109 {offsets = [0, 5], sizes = [2, 1], strides = [1, 1]} : vector<2x16xf32> to vector<2x1xf32>
    %129 = vector.broadcast %128 : vector<2x1xf32> to vector<2x32xf32>
    %130 = arith.mulf %129, %106 : vector<2x32xf32>
    %131 = arith.addf %127, %130 : vector<2x32xf32>
    %132 = vector.extract_strided_slice %109 {offsets = [0, 6], sizes = [2, 1], strides = [1, 1]} : vector<2x16xf32> to vector<2x1xf32>
    %133 = vector.broadcast %132 : vector<2x1xf32> to vector<2x32xf32>
    %134 = arith.mulf %133, %107 : vector<2x32xf32>
    %135 = arith.addf %131, %134 : vector<2x32xf32>
    %136 = vector.extract_strided_slice %109 {offsets = [0, 7], sizes = [2, 1], strides = [1, 1]} : vector<2x16xf32> to vector<2x1xf32>
    %137 = vector.broadcast %136 : vector<2x1xf32> to vector<2x32xf32>
    %138 = arith.mulf %137, %108 : vector<2x32xf32>
    %139 = arith.addf %135, %138 : vector<2x32xf32>
    %140 = vector.extract_strided_slice %109 {offsets = [0, 8], sizes = [2, 1], strides = [1, 1]} : vector<2x16xf32> to vector<2x1xf32>
    %141 = vector.broadcast %140 : vector<2x1xf32> to vector<2x32xf32>
    %142 = arith.mulf %141, %105 : vector<2x32xf32>
    %143 = vector.extract_strided_slice %109 {offsets = [0, 9], sizes = [2, 1], strides = [1, 1]} : vector<2x16xf32> to vector<2x1xf32>
    %144 = vector.broadcast %143 : vector<2x1xf32> to vector<2x32xf32>
    %145 = arith.mulf %144, %106 : vector<2x32xf32>
    %146 = arith.addf %142, %145 : vector<2x32xf32>
    %147 = vector.extract_strided_slice %109 {offsets = [0, 10], sizes = [2, 1], strides = [1, 1]} : vector<2x16xf32> to vector<2x1xf32>
    %148 = vector.broadcast %147 : vector<2x1xf32> to vector<2x32xf32>
    %149 = arith.mulf %148, %107 : vector<2x32xf32>
    %150 = arith.addf %146, %149 : vector<2x32xf32>
    %151 = vector.extract_strided_slice %109 {offsets = [0, 11], sizes = [2, 1], strides = [1, 1]} : vector<2x16xf32> to vector<2x1xf32>
    %152 = vector.broadcast %151 : vector<2x1xf32> to vector<2x32xf32>
    %153 = arith.mulf %152, %108 : vector<2x32xf32>
    %154 = arith.addf %150, %153 : vector<2x32xf32>
    %155 = vector.extract_strided_slice %109 {offsets = [0, 12], sizes = [2, 1], strides = [1, 1]} : vector<2x16xf32> to vector<2x1xf32>
    %156 = vector.broadcast %155 : vector<2x1xf32> to vector<2x32xf32>
    %157 = arith.mulf %156, %105 : vector<2x32xf32>
    %158 = vector.extract_strided_slice %109 {offsets = [0, 13], sizes = [2, 1], strides = [1, 1]} : vector<2x16xf32> to vector<2x1xf32>
    %159 = vector.broadcast %158 : vector<2x1xf32> to vector<2x32xf32>
    %160 = arith.mulf %159, %106 : vector<2x32xf32>
    %161 = arith.addf %157, %160 : vector<2x32xf32>
    %162 = vector.extract_strided_slice %109 {offsets = [0, 14], sizes = [2, 1], strides = [1, 1]} : vector<2x16xf32> to vector<2x1xf32>
    %163 = vector.broadcast %162 : vector<2x1xf32> to vector<2x32xf32>
    %164 = arith.mulf %163, %107 : vector<2x32xf32>
    %165 = arith.addf %161, %164 : vector<2x32xf32>
    %166 = vector.extract_strided_slice %109 {offsets = [0, 15], sizes = [2, 1], strides = [1, 1]} : vector<2x16xf32> to vector<2x1xf32>
    %167 = vector.broadcast %166 : vector<2x1xf32> to vector<2x32xf32>
    %168 = arith.mulf %167, %108 : vector<2x32xf32>
    %169 = arith.addf %165, %168 : vector<2x32xf32>
    %170 = arith.maximumf %124, %139 : vector<2x32xf32>
    %171 = arith.maximumf %154, %169 : vector<2x32xf32>
    %172 = arith.maximumf %170, %171 : vector<2x32xf32>
    %173 = vector.broadcast %103 : vector<1x32xf32> to vector<2x32xf32>
    %174 = arith.addf %172, %173 : vector<2x32xf32>
    %cst_40 = arith.constant 0.000000e+00 : f32
    %175 = vector.broadcast %cst_40 : f32 to vector<2x32xf32>
    %176 = arith.maximumf %174, %175 : vector<2x32xf32>
    %c0_41 = arith.constant 0 : index
    %c0_42 = arith.constant 0 : index
    %177 = vector.load %arg6[%c0_41, %c0_42] : memref<96x32xf32, #tpu.memory_space<vmem>>, vector<32x32xf32>
    %cst_43 = arith.constant dense<0.000000e+00> : vector<2x32xf32>
    %178 = tpu.matmul %176, %177, %cst_43 {dimension_numbers = #tpu.dot_dimension_numbers<[1], [0], [0], [1], [0, 0, 1, 1], [], []>} : vector<2x32xf32>, vector<32x32xf32>, vector<2x32xf32> -> vector<2x32xf32>
    %179 = arith.addf %100, %178 : vector<2x32xf32>
    %180 = math.tanh %179 : vector<2x32xf32>
    %c0_44 = arith.constant 0 : index
    %c0_45 = arith.constant 0 : index
    %181 = vector.load %arg8[%c0_44, %c0_45] : memref<2x32xf32, #tpu.memory_space<vmem>>, vector<2x32xf32>
    tpu.vector_store %arg8[%c0_44, %c0_45], %180 {strides = array<i32>} : memref<2x32xf32, #tpu.memory_space<vmem>>, vector<2x32xf32>,
    return
  }
  func.func @transform_0(%arg0: i32) -> (i32, i32) {
    %c0_i32 = arith.constant 0 : i32
    %c0_i32_0 = arith.constant 0 : i32
    %c0_i32_1 = arith.constant 0 : i32
    return %c0_i32, %c0_i32_0 : i32, i32
  }
  func.func @transform_1(%arg0: i32) -> (i32, i32) {
    %c0_i32 = arith.constant 0 : i32
    %c0_i32_0 = arith.constant 0 : i32
    %c0_i32_1 = arith.constant 0 : i32
    return %c0_i32, %c0_i32_0 : i32, i32
  }
  func.func @transform_2(%arg0: i32) -> (i32, i32) {
    %c0_i32 = arith.constant 0 : i32
    %c0_i32_0 = arith.constant 0 : i32
    %c0_i32_1 = arith.constant 0 : i32
    return %c0_i32, %c0_i32_0 : i32, i32
  }
  func.func @transform_3(%arg0: i32) -> (i32, i32) {
    %c0_i32 = arith.constant 0 : i32
    %c0_i32_0 = arith.constant 0 : i32
    %c0_i32_1 = arith.constant 0 : i32
    return %c0_i32, %c0_i32_0 : i32, i32
  }
  func.func @transform_4(%arg0: i32) -> (i32, i32) {
    %c0_i32 = arith.constant 0 : i32
    %c0_i32_0 = arith.constant 0 : i32
    %c0_i32_1 = arith.constant 0 : i32
    return %c0_i32, %c0_i32_0 : i32, i32
  }
  func.func @transform_5(%arg0: i32) -> (i32, i32) {
    %c0_i32 = arith.constant 0 : i32
    %c0_i32_0 = arith.constant 0 : i32
    %c0_i32_1 = arith.constant 0 : i32
    return %c0_i32, %c0_i32_0 : i32, i32
  }
  func.func @transform_6(%arg0: i32) -> (i32, i32) {
    %c0_i32 = arith.constant 0 : i32
    %c0_i32_0 = arith.constant 0 : i32
    %c0_i32_1 = arith.constant 0 : i32
    return %c0_i32, %c0_i32_0 : i32, i32
  }
  func.func @transform_7(%arg0: i32) -> (i32, i32) {
    %c0_i32 = arith.constant 0 : i32
    %c0_i32_0 = arith.constant 0 : i32
    %c0_i32_1 = arith.constant 0 : i32
    return %c0_i32, %c0_i32_0 : i32, i32
  }
}

</mosaic_0001>

<bundles_post_ra>
// kernel: tpu_custom_call.1
= control target key start
LH: loop header
LB: loop body
LE: loop exit
PB: predicated region body
PF: predicated region fallthrough
CT: control target
= control target key end

     0   :  { %vm37_vm0 = vcmask 64512   ;;  %s1346_s0 = inlined_call_operand.vmem [shape: f32[48,8], index: 0, kind: input, shape index: {}]   ;;  %s1347_s1 = inlined_call_operand.vmem [shape: f32[16,16], index: 1, kind: input, shape index: {}]   ;;  %s1348_s2 = inlined_call_operand.vmem [shape: f32[96,32], index: 2, kind: input, shape index: {}]   ;;  %s1349_s3 = inlined_call_operand.vmem [shape: f32[3,32], index: 3, kind: input, shape index: {}]   ;;  %s1350_s4 = inlined_call_operand.vmem [shape: f32[24,32], index: 4, kind: input, shape index: {}]   ;;  %s1351_s5 = inlined_call_operand.vmem [shape: f32[96,32], index: 5, kind: input, shape index: {}]   ;;  %s1352_s6 = inlined_call_operand.vmem [shape: f32[3,32], index: 6, kind: input, shape index: {}]   ;;  %s1353_s7 = inlined_call_operand.hbm [shape: f32[2,32], index: 7, kind: output, shape index: {}]  }
   0x1   :  { %v31_v0 = vld [vmem:[%s1350_s4 + $0x10] sm:$0xff]  ;;  %v28_v2 = vld [vmem:[%s1346_s0 + $0x18] sm:$0xff]  ;;  %v29_v3 = vld [vmem:[%s1346_s0 + $0x20] sm:$0xff] }
   0x2   :  { %v27_v1 = vld [vmem:[%s1346_s0 + $0x10] sm:$0xff]  ;;  %927 = vmatprep.subr.mxu0 %v31_v0 }
   0x3   :  { %929 = vmatprep.mubr.msk.f32.mxu0 %vm37_vm0, %v27_v1 }
   0x4   :  { %12 = vsyncpa [#allocation4], 0  ;;  %928 = vmatpush3.msra.mxu0 %v31_v0  ;;  %v30_v4 = vld [vmem:[%s1346_s0 + $0x28] sm:$0xff]  ;;  %v228_v5 = vld [vmem:[%s1348_s2 + $0x20] sm:$0xff]  ;;  %v1113_v12 = vmov 4   ;;  %v1114_v13 = vmov 0  }
   0x5   :  { %930 = vmatmul.mubr.msk.f32.vlgmr.msra.gmra.mrb[0].mxu0 %vm37_vm0, %v28_v2  ;;  %v229_v6 = vld [vmem:[%s1348_s2 + $0x28] sm:$0xff]  ;;  %v230_v8 = vld [vmem:[%s1348_s2 + $0x30] sm:$0xff]  ;;  %v231_v9 = vld [vmem:[%s1348_s2 + $0x38] sm:$0xff]  ;;  %1046 = vset.pattern.permute.xlu1 %v1113_v12  ;;  %v1115_v14 = vmov 5   ;;  %v1116_v15 = vmov 1   ;;  %v1117_v16 = vmov 8  }
   0x6   :  { %932 = vmatprep.mubr.msk.f32.mxu0 %vm37_vm0, %v29_v3  ;;  %v992_v7 = vpack.c.bf16 %v229_v6, %v228_v5  ;;  %v996_v10 = vpack.c.bf16 %v231_v9, %v230_v8  ;;  %v330_v11 = vld [vmem:[%s1347_s1 + $0x8] sm:$0xff]  ;;  %1044 = vset.pattern.permute.xlu0 %v1114_v13  ;;  %v1118_v17 = vmov 9   ;;  %v1119_v18 = vmov 12   ;;  %v877_v28 = vld [vmem:[%s1352_s6 + $0x2] ss:$0 sm:$0xff]  ;;  %v435_v52 = vld [vmem:[%s1351_s5 + $0x30] sm:$0xff] }
   0x7   :  { %356 = vperm.xlu1 %1046, %v330_v11   ;;  %333 = vperm.xlu0 %1044, %v330_v11   ;;  %v1120_v19 = vmov 2   ;;  %v1121_v20 = vmov 13   ;;  %v1122_v21 = vmov 14   ;;  %v1123_v22 = vmov 6   ;;  %v145_v46 = vld [vmem:[%s1350_s4 + $0x8] sm:$0xff]  ;;  %v433_v47 = vld [vmem:[%s1351_s5 + $0x20] sm:$0xff] }
   0x8   :  { %993 = vmatprep.subr.bf16.mxu0 %v992_v7  ;;  %v1124_v23 = vmov 11   ;;  %v1125_v24 = vmov 10   ;;  %v1126_v25 = vmov 3   ;;  %v1127_v26 = vmov 7   ;;  %v434_v48 = vld [vmem:[%s1351_s5 + $0x28] sm:$0xff]  ;;  %v436_v53 = vld [vmem:[%s1351_s5 + $0x38] sm:$0xff] }
   0x9   :  { %933 = vmatmul.mubr.msk.f32.gmra.mrb[2].mxu0 %vm37_vm0, %v30_v4  ;;  %v1128_v27 = vmov 15   ;;  %vm139_vm1 = vcmask 261120   ;;  %v1129_v45 = vmov 0.0   ;;  %vm1130_vm2 = vmmov 0   ;;  %v144_v49 = vld [vmem:[%s1346_s0 + $0x8] sm:$0xff]  ;;  %s1132_s14 = smov [#allocation3]  }
   0xa   :  { %995 = vmatpush3.bf16.msra.mxu0 %v992_v7  ;;  %935 = vmatprep.subr.mxu1 %v1129_v45  ;;  %v1001_v50 = vpack.c.bf16 %v434_v48, %v433_v47  ;;  %v1131_v51 = vmov 0.0|0.0   ;;  %v1004_v54 = vpack.c.bf16 %v436_v53, %v435_v52  ;;  %s869_s15 = sshll.u32 %s1132_s14, 4  ;;  %vm861_vm3 = vcmask 254976   ;;  %s870_s15 = int_to_ptr.vmem [resolvable:$true] %s869_s15 }
   0xb   :  { %997 = vmatprep.subr.bf16.mxu0 %v996_v10  ;;  %1047 = vset.pattern.permute.xlu1 %v1115_v14  ;;  %p1094_p1 = scmp.lt.s32.totalorder %s870_s15, %s870_s15 }
   0xc   :  { %361 = vperm.xlu1 %1047, %v330_v11   ;;  %1045 = vset.pattern.permute.xlu0 %v1116_v15 }
   0xd   :  { %338 = vperm.xlu0 %1045, %v330_v11   ;;  %936 = vmatpush3.msra.mxu1 %v145_v46 }
   0xe   :  { %999 = vmatpush3.bf16.msra.mxu0 %v996_v10  ;;  %937 = vmatprep.mubr.msk.f32.mxu1 %vm1130_vm2, %v1129_v45 }
   0xf   :  { %1000 = vmatprep.subr.bf16.mxu1 %v1131_v51  ;;  %938 = vmatmul.mubr.msk.f32.vlgmr.msra.gmra.mrb[0].mxu1 %vm37_vm0, %v144_v49 }
  0x10   :  { %1048 = vset.pattern.permute.xlu1 %v1117_v16  ;;  %1002 = vmatpush3.bf16.msra.mxu1 %v1001_v50 }
  0x11   :  { %379 = vperm.xlu1 %1048, %v330_v11   ;;  %1049 = vset.pattern.permute.xlu0 %v1118_v17 }
  0x12   :  { %384 = vperm.xlu0 %1049, %v330_v11   ;;  %962 = vmatprep.mubr.msk.f32.mxu1 %vm1130_vm2, %v1129_v45 }
  0x13   :  { %1003 = vmatprep.subr.bf16.mxu1 %v1131_v51  ;;  %1006 = vmatprep.subr.bf16.mxu0 %v1131_v51 }
  0x14   :  { %1005 = vmatpush3.bf16.msra.mxu1 %v1004_v54 }
  0x15   :  { %1050 = vset.pattern.permute.xlu1 %v1119_v18  ;;  %965 = vmatprep.subr.mxu1 %v1129_v45 }
  0x16   :  { %402 = vperm.xlu1 %1050, %v330_v11   ;;  %1052 = vset.pattern.permute.xlu0 %v1120_v19 }
  0x17   :  { %344 = vperm.xlu0 %1052, %v330_v11  }
  0x1a   :  { %1051 = vset.pattern.permute.xlu1 %v1121_v20 }
  0x1b   :  { %407 = vperm.xlu1 %1051, %v330_v11   ;;  %1055 = vset.pattern.permute.xlu0 %v1122_v21 }
  0x1c   :  { %413 = vperm.xlu0 %1055, %v330_v11  }
  0x1f   :  { %1053 = vset.pattern.permute.xlu1 %v1123_v22 }
  0x20   :  { %367 = vperm.xlu1 %1053, %v330_v11   ;;  %1058 = vset.pattern.permute.xlu0 %v1124_v23 }
  0x21   :  { %396 = vperm.xlu0 %1058, %v330_v11  }
  0x24   :  { %1054 = vset.pattern.permute.xlu1 %v1125_v24 }
  0x25   :  { %390 = vperm.xlu1 %1054, %v330_v11   ;;  %1061 = vset.pattern.permute.xlu0 %v1116_v15 }
  0x29   :  { %1056 = vset.pattern.permute.xlu1 %v1126_v25 }
  0x2a   :  { %350 = vperm.xlu1 %1056, %v330_v11  }
  0x2e   :  { %1057 = vset.pattern.permute.xlu1 %v1127_v26 }
  0x2f   :  { %373 = vperm.xlu1 %1057, %v330_v11  }
  0x33   :  { %1059 = vset.pattern.permute.xlu1 %v1128_v27 }
  0x34   :  { %419 = vperm.xlu1 %1059, %v330_v11  }
  0x38   :  { %1060 = vset.pattern.permute.xlu1 %v1114_v13 }
  0x86   :  { %v357_v55 = vpop.permute.xlu1 %356  ;;  %v334_v60 = vpop.permute.xlu0 %333 }
  0x8b   :  { %v362_v56 = vpop.permute.xlu1 %361 }
  0x8c   :  { %v339_v62 = vpop.permute.xlu0 %338 }
  0x90   :  { %v380_v57 = vpop.permute.xlu1 %379 }
  0x91   :  { %v385_v0 = vpop.permute.xlu0 %384 }
  0x95   :  { %v403_v58 = vpop.permute.xlu1 %402 }
  0x96   :  { %v345_v2 = vpop.permute.xlu0 %344 }
  0x9a   :  { %v408_v59 = vpop.permute.xlu1 %407 }
  0x9b   :  { %v414_v4 = vpop.permute.xlu0 %413 }
  0x9f   :  { %v368_v61 = vpop.permute.xlu1 %367 }
  0xa4   :  { %v391_v63 = vpop.permute.xlu1 %390 }
  0xa9   :  { %v351_v1 = vpop.permute.xlu1 %350 }
  0xae   :  { %v374_v3 = vpop.permute.xlu1 %373 }
  0xd8   :  { %v931_v29 = vpop.f32.mrb[0].mxu0 }
  0xd9   :  { %v122_v30 = vadd.f32 %v931_v29, %v877_v28  ;;  %v116_v31 = vpop.f32.mrb[1].mxu0  ;;  %v420_v29 = vpop.permute.xlu1 %419 }
  0xda   :  { %v117_v32 = vadd.f32 %v877_v28, %v116_v31 }
  0xdb   :  { %1077 = vtanh.f32 %v122_v30 }
  0xdc   :  { %1079 = vtanh.f32 %v117_v32  ;;  %v934_v33 = vpop.f32.mrb[2].mxu0 }
  0xdd   :  { %v132_v34 = vadd.f32 %v934_v33, %v877_v28  ;;  %v126_v35 = vpop.f32.mrb[3].mxu0 }
  0xde   :  { %v127_v36 = vadd.f32 %v877_v28, %v126_v35 }
  0xdf   :  { %1081 = vtanh.f32 %v132_v34  ;;  %v397_v34 = vpop.permute.xlu0 %396 }
  0xe0   :  { %1083 = vtanh.f32 %v127_v36 }
  0xe5   :  { %v1078_v37 = vpop.eup %1077 }
  0xe6   :  { %v1080_v38 = vpop.eup %1079  ;;  %141 = vst.msk [vmem:[#allocation2 + $0x8] sm:$0xff] %vm139_vm1, %v1078_v37 }
  0xe7   :  { %140 = vst.msk [vmem:[#allocation2] sm:$0xff] %vm139_vm1, %v1080_v38 }
  0xe9   :  { %v1082_v39 = vpop.eup %1081 }
  0xea   :  { %v1084_v40 = vpop.eup %1083  ;;  %143 = vst.msk [vmem:[#allocation2 + $0x18] sm:$0xff] %vm139_vm1, %v1082_v39 }
  0xeb   :  { %142 = vst.msk [vmem:[#allocation2 + $0x10] sm:$0xff] %vm139_vm1, %v1084_v40 }
  0xed   :  { %v225_v42 = vld [vmem:[#allocation2 + $0x8] sm:$0xff] }
  0xee   :  { %v224_v41 = vld [vmem:[#allocation2] sm:$0xff] }
  0xef   :  { %948 = vmatprep.mubr.msk.f32.mxu0 %vm139_vm1, %v224_v41 }
  0xf0   :  { %949 = vmatmul.mubr.msk.f32.vlgmr.msra.gmra.mrb[4].mxu0 %vm139_vm1, %v225_v42 }
  0xf1   :  { %v227_v44 = vld [vmem:[#allocation2 + $0x18] sm:$0xff] }
  0xf2   :  { %v226_v43 = vld [vmem:[#allocation2 + $0x10] sm:$0xff] }
  0xf3   :  { %951 = vmatprep.mubr.msk.f32.mxu0 %vm139_vm1, %v226_v43 }
  0xf4   :  { %952 = vmatmul.mubr.msk.f32.gmra.mrb[6].mxu0 %vm139_vm1, %v227_v44 }
  0xf5   :  { %978 = vmatprep.mubr.msk.f32.mxu0 %vm1130_vm2, %v1129_v45 }
 0x1c3   :  { %v950_v5 = vpop.f32.mrb[4].mxu0 }
 0x1c4   :  { %v341_v6 = vmul.f32 %v950_v5, %v339_v62  ;;  %v364_v7 = vmul.f32 %v950_v5, %v362_v56  ;;  %v387_v8 = vmul.f32 %v950_v5, %v385_v0  ;;  %v410_v9 = vmul.f32 %v950_v5, %v408_v59  ;;  %v311_v10 = vpop.f32.mrb[5].mxu0  ;;  %v595_v62 = vld [vmem:[%s1348_s2 + $0x8] sm:$0xff]  ;;  %v596_v0 = vld [vmem:[%s1348_s2 + $0x10] sm:$0xff] }
 0x1c5   :  { %v336_v11 = vmul.f32 %v334_v60, %v311_v10  ;;  %v359_v13 = vmul.f32 %v357_v55, %v311_v10  ;;  %v382_v15 = vmul.f32 %v380_v57, %v311_v10  ;;  %v405_v28 = vmul.f32 %v403_v58, %v311_v10  ;;  %v888_v57 = vld [vmem:[%s1349_s3 + $0x1] ss:$0 sm:$0xff] }
 0x1c7   :  { %v342_v30 = vadd.f32 %v341_v6, %v336_v11  ;;  %v365_v31 = vadd.f32 %v364_v7, %v359_v13  ;;  %v388_v32 = vadd.f32 %v387_v8, %v382_v15  ;;  %v411_v33 = vadd.f32 %v410_v9, %v405_v28  ;;  %v953_v35 = vpop.f32.mrb[6].mxu0 }
 0x1c8   :  { %v321_v36 = vpop.f32.mrb[7].mxu0  ;;  %v353_v41 = vmul.f32 %v953_v35, %v351_v1  ;;  %v376_v42 = vmul.f32 %v953_v35, %v374_v3  ;;  %v399_v43 = vmul.f32 %v953_v35, %v397_v34  ;;  %v422_v44 = vmul.f32 %v953_v35, %v420_v29  ;;  %v597_v1 = vld [vmem:[%s1348_s2 + $0x18] sm:$0xff]  ;;  %v672_v3 = vld [vmem:[%s1347_s1] sm:$0x3] }
 0x1c9   :  { %v347_v37 = vmul.f32 %v345_v2, %v321_v36  ;;  %v370_v38 = vmul.f32 %v368_v61, %v321_v36  ;;  %v393_v39 = vmul.f32 %v391_v63, %v321_v36  ;;  %v416_v40 = vmul.f32 %v414_v4, %v321_v36  ;;  %v594_v61 = vld [vmem:[%s1348_s2] sm:$0xff]  ;;  %675 = vperm.xlu1 %1060, %v672_v3  }
 0x1ca   :  { %v1007_v63 = vpack.c.bf16 %v595_v62, %v594_v61  ;;  %v1010_v2 = vpack.c.bf16 %v597_v1, %v596_v0  ;;  %680 = vperm.xlu0 %1061, %v672_v3  }
 0x1cb   :  { %v348_v46 = vadd.f32 %v347_v37, %v342_v30  ;;  %v371_v47 = vadd.f32 %v370_v38, %v365_v31  ;;  %v394_v48 = vadd.f32 %v393_v39, %v388_v32  ;;  %v417_v49 = vadd.f32 %v416_v40, %v411_v33 }
 0x1cc   :  { %1008 = vmatpush3.bf16.msra.mxu0 %v1007_v63 }
 0x1cd   :  { %v354_v50 = vadd.f32 %v353_v41, %v348_v46  ;;  %v377_v52 = vadd.f32 %v376_v42, %v371_v47  ;;  %v400_v53 = vadd.f32 %v399_v43, %v394_v48  ;;  %v423_v54 = vadd.f32 %v422_v44, %v417_v49  ;;  %1009 = vmatprep.subr.bf16.mxu0 %v1131_v51 }
 0x1ce   :  { %1062 = vset.pattern.permute.xlu1 %v1113_v12  ;;  %1064 = vset.pattern.permute.xlu0 %v1117_v16  ;;  %v882_v12 = vld [vmem:[%s1352_s6 + $0x1] ss:$0 sm:$0xff] }
 0x1cf   :  { %v424_v55 = vmax.f32 %v354_v50, %v377_v52  ;;  %v425_v56 = vmax.f32 %v400_v53, %v423_v54  ;;  %705 = vperm.xlu1 %1062, %v672_v3   ;;  %728 = vperm.xlu0 %1064, %v672_v3  }
 0x1d0   :  { %1011 = vmatpush3.bf16.msra.mxu0 %v1010_v2 }
 0x1d1   :  { %v426_v58 = vmax.f32 %v424_v55, %v425_v56 }
 0x1d3   :  { %v431_v59 = vadd.f32 %v888_v57, %v426_v58  ;;  %1063 = vset.pattern.permute.xlu1 %v1115_v14  ;;  %1067 = vset.pattern.permute.xlu0 %v1121_v20  ;;  %v514_v20 = vld [vmem:[%s1350_s4] sm:$0xff] }
 0x1d4   :  { %710 = vperm.xlu1 %1063, %v672_v3   ;;  %756 = vperm.xlu0 %1067, %v672_v3  }
 0x1d5   :  { %v432_v60 = vmax.f32 %v431_v59, 0.0 }
 0x1d7   :  { %963 = vmatmul.mubr.msk.f32.vlgmr.msra.gmra.mrb[0].mxu1 %vm139_vm1, %v432_v60 }
 0x1d8   :  { %967 = vmatprep.mubr.msk.f32.mxu1 %vm1130_vm2, %v1129_v45  ;;  %1065 = vset.pattern.permute.xlu1 %v1118_v17 }
 0x1d9   :  { %1070 = vset.pattern.permute.xlu0 %v1125_v24  ;;  %733 = vperm.xlu1 %1065, %v672_v3  }
 0x1da   :  { %739 = vperm.xlu0 %1070, %v672_v3   ;;  %966 = vmatpush3.msra.mxu1 %v514_v20 }
 0x1db   :  { %1012 = vmatprep.subr.bf16.mxu1 %v1131_v51 }
 0x1dd   :  { %1066 = vset.pattern.permute.xlu1 %v1119_v18 }
 0x1de   :  { %1073 = vset.pattern.permute.xlu0 %v1127_v26  ;;  %751 = vperm.xlu1 %1066, %v672_v3   ;;  %v785_v26 = vld [vmem:[%s1351_s5 + $0x18] sm:$0xff] }
 0x1df   :  { %722 = vperm.xlu0 %1073, %v672_v3  }
 0x1e2   :  { %1068 = vset.pattern.permute.xlu1 %v1120_v19 }
 0x1e3   :  { %1076 = vset.pattern.permute.xlu0 %v1128_v27  ;;  %689 = vperm.xlu1 %1068, %v672_v3  }
 0x1e7   :  { %1069 = vset.pattern.permute.xlu1 %v1123_v22  ;;  %v783_v22 = vld [vmem:[%s1351_s5 + $0x8] sm:$0xff] }
 0x1e8   :  { %716 = vperm.xlu1 %1069, %v672_v3  }
 0x1ec   :  { %1071 = vset.pattern.permute.xlu1 %v1122_v21  ;;  %v782_v21 = vld [vmem:[%s1351_s5] sm:$0xff] }
 0x1ed   :  { %762 = vperm.xlu1 %1071, %v672_v3   ;;  %v1013_v24 = vpack.c.bf16 %v783_v22, %v782_v21 }
 0x1f1   :  { %1072 = vset.pattern.permute.xlu1 %v1126_v25  ;;  %v784_v25 = vld [vmem:[%s1351_s5 + $0x10] sm:$0xff] }
 0x1f2   :  { %697 = vperm.xlu1 %1072, %v672_v3  }
 0x1f6   :  { %1074 = vset.pattern.permute.xlu1 %v1124_v23  ;;  %v513_v23 = vld [vmem:[%s1346_s0] sm:$0x3] }
 0x1f7   :  { %745 = vperm.xlu1 %1074, %v672_v3   ;;  %968 = vmatmul.mubr.msk.f32.vlgmr.msra.gmra.mrb[2].mxu1 %vm37_vm0, %v513_v23 }
 0x1f8   :  { %1014 = vmatpush3.bf16.msra.mxu1 %v1013_v24  ;;  %989 = vmatprep.mubr.msk.f32.mxu1 %vm1130_vm2, %v1129_v45 }
 0x1f9   :  { %1015 = vmatprep.subr.bf16.mxu1 %v1131_v51 }
 0x1fb   :  { %1075 = vset.pattern.permute.xlu1 %v1128_v27  ;;  %v1016_v27 = vpack.c.bf16 %v785_v26, %v784_v25 }
 0x1fc   :  { %768 = vperm.xlu1 %1075, %v672_v3  }
 0x1fd   :  { %1017 = vmatpush3.bf16.msra.mxu1 %v1016_v27 }
 0x248   :  { %v676_v4 = vpop.permute.xlu1 %675 }
 0x249   :  { %v681_v45 = vpop.permute.xlu0 %680 }
 0x24e   :  { %v706_v5 = vpop.permute.xlu1 %705  ;;  %v729_v51 = vpop.permute.xlu0 %728 }
 0x253   :  { %v711_v6 = vpop.permute.xlu1 %710  ;;  %v757_v15 = vpop.permute.xlu0 %756 }
 0x258   :  { %v734_v7 = vpop.permute.xlu1 %733 }
 0x259   :  { %v740_v29 = vpop.permute.xlu0 %739 }
 0x25d   :  { %v752_v8 = vpop.permute.xlu1 %751 }
 0x25e   :  { %v723_v52 = vpop.permute.xlu0 %722 }
 0x262   :  { %v690_v9 = vpop.permute.xlu1 %689 }
 0x267   :  { %v717_v10 = vpop.permute.xlu1 %716 }
 0x26c   :  { %v763_v11 = vpop.permute.xlu1 %762 }
 0x271   :  { %v698_v13 = vpop.permute.xlu1 %697 }
 0x276   :  { %v746_v28 = vpop.permute.xlu1 %745 }
 0x27b   :  { %v769_v35 = vpop.permute.xlu1 %768 }
 0x2aa   :  { %v506_v14 = vpop.f32.mrb[0].mxu1 }
 0x2ab   :  { %v1018_v16 = vadd.f32 %v882_v12, %v506_v14  ;;  %v964_v17 = vpop.f32.mrb[1].mxu1  ;;  %v893_v14 = vld [vmem:[%s1349_s3] ss:$0 sm:$0xff]  ;;  %s1089_s3 = scalar_lea.vmem %s870_s15, 32 }
 0x2ac   :  { %p1090_p0 = scmp.ne.s32.totalorder %s870_s15, %s1089_s3  ;;  %p1095_p2 = scmp.lt.s32.totalorder %s1089_s3, %s1089_s3 }
 0x2ad   :  { %1085 = vtanh.f32 %v1018_v16 }
 0x2ae   :  { %p1096_p3 = por %p1095_p2, %p1094_p1 }
 0x2b0   :  { %p1097_p4 = pnand %p1096_p3, %p1090_p0 }
 0x2b7   :  { %v1086_v18 = vpop.eup %1085 }
 0x2b8   :  { %512 = vst.msk [vmem:[#allocation2] sm:$0xff] %vm139_vm1, %v1086_v18 }
 0x2bf   :  { %v593_v19 = vld [vmem:[#allocation2] sm:$0xff] }
 0x2c0   :  { %979 = vmatmul.mubr.msk.f32.vlgmr.msra.gmra.mrb[8].mxu0 %vm139_vm1, %v593_v19  ;;  %v890_v19 = vld [vmem:[%s1352_s6] ss:$0 sm:$0xff] }
 0x393   :  { %v668_v30 = vpop.f32.mrb[8].mxu0 }
 0x394   :  { %v684_v31 = vrot.slane %v668_v30, 2  ;;  %v980_v32 = vpop.f32.mrb[9].mxu0  ;;  %v692_v33 = vrot.slane %v668_v30, 4  ;;  %v700_v34 = vrot.slane %v668_v30, 6  ;;  %v731_v36 = vmul.f32 %v729_v51, %v668_v30 }
 0x395   :  { %v754_v38 = vmul.f32 %v752_v8, %v668_v30  ;;  %v678_v41 = vmul.f32 %v676_v4, %v668_v30  ;;  %v708_v43 = vmul.f32 %v706_v5, %v668_v30 }
 0x396   :  { %v736_v37 = vmul.f32 %v734_v7, %v684_v31  ;;  %v759_v39 = vmul.f32 %v757_v15, %v684_v31  ;;  %v742_v40 = vmul.f32 %v740_v29, %v692_v33  ;;  %v686_v42 = vmul.f32 %v684_v31, %v681_v45 }
 0x397   :  { %v765_v47 = vmul.f32 %v763_v11, %v692_v33  ;;  %v713_v48 = vmul.f32 %v711_v6, %v684_v31  ;;  %v748_v49 = vmul.f32 %v746_v28, %v700_v34  ;;  %v771_v50 = vmul.f32 %v769_v35, %v700_v34 }
 0x398   :  { %v737_v44 = vadd.f32 %v736_v37, %v731_v36  ;;  %v760_v46 = vadd.f32 %v759_v39, %v754_v38  ;;  %v687_v53 = vadd.f32 %v686_v42, %v678_v41  ;;  %v694_v54 = vmul.f32 %v692_v33, %v690_v9 }
 0x399   :  { %v714_v57 = vadd.f32 %v713_v48, %v708_v43  ;;  %v719_v58 = vmul.f32 %v717_v10, %v692_v33  ;;  %v702_v60 = vmul.f32 %v700_v34, %v698_v13  ;;  %v725_v0 = vmul.f32 %v723_v52, %v700_v34 }
 0x39a   :  { %v743_v55 = vadd.f32 %v742_v40, %v737_v44  ;;  %v766_v56 = vadd.f32 %v765_v47, %v760_v46  ;;  %v695_v59 = vadd.f32 %v694_v54, %v687_v53 }
 0x39b   :  { %v720_v63 = vadd.f32 %v719_v58, %v714_v57 }
 0x39c   :  { %v749_v61 = vadd.f32 %v748_v49, %v743_v55  ;;  %v772_v62 = vadd.f32 %v771_v50, %v766_v56  ;;  %v703_v1 = vadd.f32 %v702_v60, %v695_v59 }
 0x39d   :  { %v726_v3 = vadd.f32 %v725_v0, %v720_v63 }
 0x39e   :  { %v774_v2 = vmax.f32 %v749_v61, %v772_v62 }
 0x39f   :  { %v773_v12 = vmax.f32 %v703_v1, %v726_v3 }
 0x3a1   :  { %v775_v16 = vmax.f32 %v773_v12, %v774_v2 }
 0x3a3   :  { %v780_v17 = vadd.f32 %v893_v14, %v775_v16 }
 0x3a5   :  { %v781_v18 = vmax.f32 %v780_v17, 0.0 }
 0x3a7   :  { %990 = vmatmul.mubr.msk.f32.vlgmr.msra.gmra.mrb[2].mxu1 %vm139_vm1, %v781_v18 }
 0x47a   :  { %v855_v20 = vpop.f32.mrb[2].mxu1 }
 0x47b   :  { %v1019_v21 = vadd.f32 %v890_v19, %v855_v20  ;;  %v991_v22 = vpop.f32.mrb[3].mxu1 }
 0x47d   :  { %1087 = vtanh.f32 %v1019_v21 }
 0x487   :  { %v1088_v23 = vpop.eup %1087 }
 0x488   :  { %862 = vst.msk [vmem:[#allocation3] sm:$0x3] %vm861_vm3, %v1088_v23 }
 0x489   :  { %1100 = shalt.err (!%p1097_p4)
}
 0x48a   :  { %s1101_s6 = scalar_lea.hbm %s1353_s7, 32 }
 0x48b   :  { %p1102_p5 = scmp.ne.s32.totalorder %s1353_s7, %s1101_s6  ;;  %p1105_p6 = scmp.lt.u32.totalorder %s1101_s6, %s1353_s7 }
 0x48d   :  { %p1107_p7 = pnand %p1105_p6, %p1102_p5 }
 0x48f   :  { %1110 = shalt.err (!%p1107_p7)
}
 0x490   :  { %872 = dma.vmem_to_hbm [thread:$0]  %s870_s15, 32, %s1353_s7, [#allocation4]  }
 0x491   :  { %1111 = dma.done.wait [#allocation4], 32  }
 0x492   :  { %1112 = vsyncadd [#allocation4], 4294967264 }
 0x493   :  { %876 = vsyncpa [#allocation4], 1 }

</bundles_post_ra>
